<compile_context>
chip_gen: v7x
topology: tpu7x:2x2x1
jax: 0.10.0
libtpu: 0.0.40
codegen_flags: <defaults>
</compile_context>

<pallas_src>
import math

import jax
import jax.numpy as jnp
from jax.experimental import pallas as pl
from jax.experimental.pallas import tpu as pltpu

MXU_DTYPE = jnp.bfloat16      # matmul operand dtype (accumulation stays f32)
GATES_DTYPE = jnp.bfloat16    # precomputed input-projection gates in HBM
HIDDEN_DTYPE = jnp.bfloat16   # LSTM hidden-state output in HBM

_VMEM_LIMIT_CACHE = None
_BATCH_BLOCKS_CACHE = None


def _vmem_limit_bytes():
    """Generation-aware scoped-VMEM limit (v5e/v6e: 128 MiB, v7x: 64 MiB)."""
    global _VMEM_LIMIT_CACHE
    if _VMEM_LIMIT_CACHE is None:
        cap = 64 * 1024 * 1024  # conservative fallback (v7x per-TC physical)
        try:
            info = pltpu.get_tpu_info()
            cap = int(getattr(info, "vmem_capacity_bytes", cap) or cap)
        except Exception:
            pass
        # leave headroom for compiler-internal scratch; cap at 100 MiB
        _VMEM_LIMIT_CACHE = int(min(cap * 3 // 4, 100 * 1024 * 1024))
    return _VMEM_LIMIT_CACHE


def _default_batch_blocks():
    """2 only when 2 TensorCores/chip exist (v7x megacore); otherwise 1."""
    global _BATCH_BLOCKS_CACHE
    if _BATCH_BLOCKS_CACHE is None:
        blocks = 1
        try:
            kind = jax.devices()[0].device_kind.lower()
            if "v7" in kind:
                blocks = 2
        except Exception:
            pass
        _BATCH_BLOCKS_CACHE = blocks
    return _BATCH_BLOCKS_CACHE


def _sigmoid(z):
    # EUP-light exact sigmoid: one tanh per call instead of exp + reciprocal.
    return 0.5 * (jnp.tanh(0.5 * z) + 1.0)


def _pick_tile(n, target):
    """Largest multiple of 8 that divides n and is <= target; else n itself."""
    best = None
    t = 8
    while t <= min(target, n):
        if n % t == 0:
            best = t
        t += 8
    return best if best is not None else n


def _pick_t_chunk(T, b_tile, H, vmem_limit):
    # Per-timestep VMEM of the chunk pipeline: bf16 gx in (4H) + bf16 h out (H),
    # each double-buffered.
    per_t = max(b_tile * (4 * H + H) * 2 * 2, 1)
    budget = max(vmem_limit // 2, 1)          # leave room for weights/scratch
    cap = max(8, budget // per_t)
    return _pick_tile(T, min(cap, 256))


# --------------------------------------------------------------------------
# Kernel 1: fused input projection.  x streamed once; emits
#   gates    = x @ W_ih^T + (b_ih + b_hh)        (bf16)
#   residual = x @ W_proj^T + b_proj             (f32, only when projecting)
# Row-tiled over the time-major flattened rows (T*B), fully parallel.
# --------------------------------------------------------------------------
def _proj_fused_kernel(x_ref, wg_ref, wr_ref, bg_ref, br_ref, g_ref, r_ref):
    x = x_ref[...]
    g_ref[...] = (jnp.dot(x, wg_ref[...], preferred_element_type=jnp.float32)
                  + bg_ref[...]).astype(g_ref.dtype)
    r_ref[...] = (jnp.dot(x, wr_ref[...], preferred_element_type=jnp.float32)
                  + br_ref[...]).astype(r_ref.dtype)


def _proj_gates_kernel(x_ref, wg_ref, bg_ref, g_ref):
    g_ref[...] = (jnp.dot(x_ref[...], wg_ref[...],
                          preferred_element_type=jnp.float32)
                  + bg_ref[...]).astype(g_ref.dtype)


def _input_projection_tm(x_tm, w_ih, bias_gates, w_proj=None, b_proj=None,
                         row_tile_target=512):
    """x_tm: (T, B, D) time-major -> (gates (T,B,4H) bf16, residual (T*B,2H) f32 | None)."""
    T, B, D = x_tm.shape
    G = w_ih.shape[0]                                 # 4 * hidden
    N = T * B
    row_tile = _pick_tile(N, row_tile_target)
    x_flat = x_tm.reshape(N, D).astype(MXU_DTYPE)     # bf16 MXU operand
    wg_t = jnp.transpose(w_ih).astype(MXU_DTYPE)      # (D, 4H)
    bg = bias_gates.reshape(1, G).astype(jnp.float32)
    cp = pltpu.CompilerParams(dimension_semantics=("parallel",),
                              vmem_limit_bytes=_vmem_limit_bytes())
    grid = (N // row_tile,)

    if w_proj is not None:
        R = w_proj.shape[0]                           # 2 * hidden
        wr_t = jnp.transpose(w_proj).astype(MXU_DTYPE)
        br = b_proj.reshape(1, R).astype(jnp.float32)
        gates_flat, res_flat = pl.pallas_call(
            _proj_fused_kernel,
            out_shape=(jax.ShapeDtypeStruct((N, G), GATES_DTYPE),
                       jax.ShapeDtypeStruct((N, R), jnp.float32)),
            grid=grid,
            in_specs=[
                pl.BlockSpec((row_tile, D), lambda i: (i, 0)),
                pl.BlockSpec((D, G), lambda i: (0, 0)),
                pl.BlockSpec((D, R), lambda i: (0, 0)),
                pl.BlockSpec((1, G), lambda i: (0, 0)),
                pl.BlockSpec((1, R), lambda i: (0, 0)),
            ],
            out_specs=(pl.BlockSpec((row_tile, G), lambda i: (i, 0)),
                       pl.BlockSpec((row_tile, R), lambda i: (i, 0))),
            compiler_params=cp,
        )(x_flat, wg_t, wr_t, bg, br)
    else:
        gates_flat = pl.pallas_call(
            _proj_gates_kernel,
            out_shape=jax.ShapeDtypeStruct((N, G), GATES_DTYPE),
            grid=grid,
            in_specs=[
                pl.BlockSpec((row_tile, D), lambda i: (i, 0)),
                pl.BlockSpec((D, G), lambda i: (0, 0)),
                pl.BlockSpec((1, G), lambda i: (0, 0)),
            ],
            out_specs=pl.BlockSpec((row_tile, G), lambda i: (i, 0)),
            compiler_params=cp,
        )(x_flat, wg_t, bg)
        res_flat = None
    return gates_flat.reshape(T, B, G), res_flat


# --------------------------------------------------------------------------
# Kernel 2: LSTM recurrence, time-major.  grid = (batch_blocks 'parallel',
# T_chunks 'arbitrary').  Only the small (b_tile,H)@(H,4H) recurrent dot and
# the elementwise gates remain in the serial loop; each timestep is a
# contiguous (b_tile, 4H) load and a full-width (b_tile, H) store.
# --------------------------------------------------------------------------
def _lstm_recurrence_kernel(gx_ref, whh_ref, out_ref, h_scr, c_scr):
    # time is the fastest-varying grid axis -> reset state when a new batch
    # block starts (t == 0).
    @pl.when(pl.program_id(1) == 0)
    def _():
        h_scr[...] = jnp.zeros_like(h_scr)
        c_scr[...] = jnp.zeros_like(c_scr)

    H = whh_ref.shape[0]
    t_chunk = gx_ref.shape[0]
    whh = whh_ref[...]                       # (H, 4H) bf16, resident for the chunk

    def step(s, carry):
        h, c = carry
        gx_s = gx_ref[s].astype(jnp.float32)                    # (b_tile, 4H)
        gates = gx_s + jnp.dot(h.astype(whh.dtype), whh,
                               preferred_element_type=jnp.float32)
        # PyTorch gate order along 4H: [i, f, g, o]
        i_g = _sigmoid(gates[:, 0 * H:1 * H])
        f_g = _sigmoid(gates[:, 1 * H:2 * H])
        g_g = jnp.tanh(gates[:, 2 * H:3 * H])
        o_g = _sigmoid(gates[:, 3 * H:4 * H])
        c = f_g * c + i_g * g_g
        h = o_g * jnp.tanh(c)
        out_ref[s] = h.astype(out_ref.dtype)                    # full-width store
        return h, c

    # Modest unroll: LLO scheduling visibility without blowing vreg pressure.
    h, c = jax.lax.fori_loop(0, t_chunk, step, (h_scr[...], c_scr[...]),
                             unroll=2)
    h_scr[...] = h
    c_scr[...] = c


def _lstm_recurrence_tm(gates_tm, w_hh, *, batch_blocks=None, t_chunk_target=None):
    """gates_tm: (T, B, 4H) -> hidden states (T, B, H), zero initial state."""
    T, B, G = gates_tm.shape
    H = w_hh.shape[1]
    n_b = _default_batch_blocks() if batch_blocks is None else batch_blocks
    if not (B >= n_b and B % n_b == 0):
        n_b = 1
    b_tile = B // n_b
    if t_chunk_target is None:
        t_chunk = _pick_t_chunk(T, b_tile, H, _vmem_limit_bytes())
    else:
        t_chunk = _pick_tile(T, t_chunk_target)
    whh_t = jnp.transpose(w_hh).astype(MXU_DTYPE)               # (H, 4H)

    return pl.pallas_call(
        _lstm_recurrence_kernel,
        out_shape=jax.ShapeDtypeStruct((T, B, H), HIDDEN_DTYPE),
        grid=(n_b, T // t_chunk),
        in_specs=[
            pl.BlockSpec((t_chunk, b_tile, G), lambda b, t: (t, b, 0)),
            pl.BlockSpec((H, G), lambda b, t: (0, 0)),
        ],
        out_specs=pl.BlockSpec((t_chunk, b_tile, H), lambda b, t: (t, b, 0)),
        scratch_shapes=[
            pltpu.VMEM((b_tile, H), jnp.float32),   # h (carried across chunks)
            pltpu.VMEM((b_tile, H), jnp.float32),   # c
        ],
        compiler_params=pltpu.CompilerParams(
            dimension_semantics=("parallel", "arbitrary"),
            vmem_limit_bytes=_vmem_limit_bytes()),
    )(gates_tm, whh_t)


# --------------------------------------------------------------------------
# Kernel 3: residual add (same broadcasting rule as the PyTorch reference) +
# LayerNorm (eps=1e-5, biased variance) + eval-mode dropout (identity).
# Row-tiled, fully parallel; residual projection already hoisted into kernel 1.
# --------------------------------------------------------------------------
def _res_ln_kernel(res_ref, lstm_ref, g_ref, b_ref, o_ref):
    v = res_ref[...].astype(jnp.float32) + lstm_ref[...].astype(jnp.float32)
    mean = jnp.mean(v, axis=-1, keepdims=True)
    var = jnp.mean(jnp.square(v - mean), axis=-1, keepdims=True)
    y = (v - mean) * jax.lax.rsqrt(var + 1e-5) * g_ref[...] + b_ref[...]
    # TODO(synk): training-mode nn.Dropout (stochastic mask via pltpu.prng_*) not
    # implemented; eval-mode identity.
    o_ref[...] = y.astype(o_ref.dtype)


def _residual_layernorm(res_flat, lstm_flat, gamma, beta, out_dtype,
                        row_tile_target=512):
    N = res_flat.shape[0]
    Fdim = gamma.shape[-1]                     # 2 * hidden
    H = lstm_flat.shape[-1]
    row_tile = _pick_tile(N, row_tile_target)
    g = gamma.reshape(1, Fdim).astype(jnp.float32)
    b = beta.reshape(1, Fdim).astype(jnp.float32)
    return pl.pallas_call(
        _res_ln_kernel,
        out_shape=jax.ShapeDtypeStruct((N, Fdim), out_dtype),
        grid=(N // row_tile,),
        in_specs=[
            pl.BlockSpec((row_tile, res_flat.shape[1]), lambda i: (i, 0)),
            pl.BlockSpec((row_tile, H), lambda i: (i, 0)),
            pl.BlockSpec((1, Fdim), lambda i: (0, 0)),
            pl.BlockSpec((1, Fdim), lambda i: (0, 0)),
        ],
        out_specs=pl.BlockSpec((row_tile, Fdim), lambda i: (i, 0)),
        compiler_params=pltpu.CompilerParams(
            dimension_semantics=("parallel",),
            vmem_limit_bytes=_vmem_limit_bytes()),
    )(res_flat, lstm_flat, g, b)


# --------------------------------------------------------------------------
# Module: parameter init (deterministic) + forward
# --------------------------------------------------------------------------
def init_residual_block_params(key, input_size, hidden_size):
    k_lstm = 1.0 / math.sqrt(hidden_size)
    keys = jax.random.split(key, 6)
    params = {
        "w_ih": jax.random.uniform(keys[0], (4 * hidden_size, input_size),
                                   jnp.float32, -k_lstm, k_lstm),
        "w_hh": jax.random.uniform(keys[1], (4 * hidden_size, hidden_size),
                                   jnp.float32, -k_lstm, k_lstm),
        "b_ih": jax.random.uniform(keys[2], (4 * hidden_size,), jnp.float32,
                                   -k_lstm, k_lstm),
        "b_hh": jax.random.uniform(keys[3], (4 * hidden_size,), jnp.float32,
                                   -k_lstm, k_lstm),
        "ln_gamma": jnp.ones((2 * hidden_size,), jnp.float32),
        "ln_beta": jnp.zeros((2 * hidden_size,), jnp.float32),
    }
    if input_size != 2 * hidden_size:
        k_lin = 1.0 / math.sqrt(input_size)
        params["w_proj"] = jax.random.uniform(keys[4], (2 * hidden_size, input_size),
                                              jnp.float32, -k_lin, k_lin)
        params["b_proj"] = jax.random.uniform(keys[5], (2 * hidden_size,),
                                              jnp.float32, -k_lin, k_lin)
    return params


def lstm_forward(x, w_ih, w_hh, b_ih, b_hh):
    """x: (B, T, D) batch-first -> (B, T, H) (zero initial state, PyTorch default)."""
    x_tm = jnp.swapaxes(x, 0, 1)                              # (T, B, D) time-major
    gates_tm, _ = _input_projection_tm(x_tm, w_ih, b_ih + b_hh)
    lstm_tm = _lstm_recurrence_tm(gates_tm, w_hh)             # (T, B, H) bf16
    return jnp.swapaxes(lstm_tm, 0, 1).astype(x.dtype)


def residual_block_forward(x, params):
    B, T, D = x.shape
    H = params["w_hh"].shape[1]
    x_tm = jnp.swapaxes(x, 0, 1)                              # layout plumbing
    gates_tm, res_flat = _input_projection_tm(
        x_tm, params["w_ih"], params["b_ih"] + params["b_hh"],
        w_proj=params.get("w_proj"), b_proj=params.get("b_proj"))
    lstm_tm = _lstm_recurrence_tm(gates_tm, params["w_hh"])   # (T, B, H) bf16
    if res_flat is None:                                      # input_size == 2*hidden
        res_flat = x_tm.reshape(T * B, D)
    out_flat = _residual_layernorm(res_flat, lstm_tm.reshape(T * B, H),
                                   params["ln_gamma"], params["ln_beta"], x.dtype)
    return jnp.swapaxes(out_flat.reshape(T, B, 2 * H), 0, 1)


# Pure-JAX f32 reference LSTM for a numerical sanity check of the restructured
# (hoisted-projection, time-major, chunked) recurrence.
def _lstm_reference(x, w_ih, w_hh, b_ih, b_hh):
    B, T, D = x.shape
    H = w_hh.shape[1]
    h = jnp.zeros((B, H), jnp.float32)
    c = jnp.zeros((B, H), jnp.float32)
    outs = []
    for t in range(T):
        gates = x[:, t, :] @ w_ih.T + h @ w_hh.T + b_ih + b_hh
        i_g = jax.nn.sigmoid(gates[:, 0 * H:1 * H])
        f_g = jax.nn.sigmoid(gates[:, 1 * H:2 * H])
        g_g = jnp.tanh(gates[:, 2 * H:3 * H])
        o_g = jax.nn.sigmoid(gates[:, 3 * H:4 * H])
        c = f_g * c + i_g * g_g
        h = o_g * jnp.tanh(c)
        outs.append(h)
    return jnp.stack(outs, axis=1)


if __name__ == "__main__":
    # hidden_size == 1 is the only configuration in which the reference
    # forward's (2H) + (H) residual add broadcasts (see note at top).
    B, T, D, H = 2, 8, 16, 1
    key = jax.random.PRNGKey(0)
    pkey, xkey = jax.random.split(key)
    params = init_residual_block_params(pkey, D, H)
    x = jax.random.normal(xkey, (B, T, D), jnp.float32)

    # Sanity-check the restructured LSTM against a pure-JAX f32 reference
    # (tolerance accounts for bf16 MXU operands / bf16 gate & hidden storage).
    lstm_out = jax.block_until_ready(
        lstm_forward(x, params["w_ih"], params["w_hh"], params["b_ih"], params["b_hh"]))
    lstm_ref = _lstm_reference(x, params["w_ih"], params["w_hh"],
                               params["b_ih"], params["b_hh"])
    assert float(jnp.max(jnp.abs(lstm_out - lstm_ref))) < 5e-2, "LSTM mismatch"

    out = jax.block_until_ready(residual_block_forward(x, params))
    assert out.shape == (B, T, 2 * H), out.shape
    assert bool(jnp.all(jnp.isfinite(out)))

    # Identity-residual configuration (input_size == 2*hidden): exercises the
    # gates-only projection kernel and the no-projection residual path.
    D2 = 2 * H
    params2 = init_residual_block_params(pkey, D2, H)
    x2 = jax.random.normal(xkey, (B, T, D2), jnp.float32)
    out2 = jax.block_until_ready(residual_block_forward(x2, params2))
    assert out2.shape == (B, T, 2 * H), out2.shape
    assert bool(jnp.all(jnp.isfinite(out2)))

    print("KERNEL_OK")
</pallas_src>

<mosaic_0001>
module attributes {stable_mosaic.version = 11 : i64} {
  func.func @_proj_gates_kernel(%arg0: i32, %arg1: memref<16x16xbf16, #tpu.memory_space<vmem>>, %arg2: memref<16x4xbf16, #tpu.memory_space<vmem>>, %arg3: memref<1x4xf32, #tpu.memory_space<vmem>>, %arg4: memref<16x4xbf16, #tpu.memory_space<vmem>>) attributes {dimension_semantics = [#tpu.dimension_semantics<parallel>], iteration_bounds = array<i64: 1>, scalar_prefetch = 0 : i64, scratch_operands = 0 : i64, tpu.core_type = #tpu.core_type<tc>, window_params = [{transform_indices = @transform_0, window_bounds = array<i64: 16, 16>}, {pipeline_mode = #tpu.pipeline_mode<synchronous>, transform_indices = @transform_1, window_bounds = array<i64: 16, 4>}, {pipeline_mode = #tpu.pipeline_mode<synchronous>, transform_indices = @transform_2, window_bounds = array<i64: 1, 4>}, {transform_indices = @transform_3, window_bounds = array<i64: 16, 4>}]} {
    %c0 = arith.constant 0 : index
    %c0_0 = arith.constant 0 : index
    %0 = vector.load %arg1[%c0, %c0_0] : memref<16x16xbf16, #tpu.memory_space<vmem>>, vector<16x16xbf16>
    %c0_1 = arith.constant 0 : index
    %c0_2 = arith.constant 0 : index
    %1 = vector.load %arg2[%c0_1, %c0_2] : memref<16x4xbf16, #tpu.memory_space<vmem>>, vector<16x4xbf16>
    %cst = arith.constant dense<0.000000e+00> : vector<16x4xf32>
    %2 = tpu.matmul %0, %1, %cst {dimension_numbers = #tpu.dot_dimension_numbers<[1], [0], [0], [1], [0, 0, 1, 1], [], []>} : vector<16x16xbf16>, vector<16x4xbf16>, vector<16x4xf32> -> vector<16x4xf32>
    %c0_3 = arith.constant 0 : index
    %c0_4 = arith.constant 0 : index
    %3 = vector.load %arg3[%c0_3, %c0_4] : memref<1x4xf32, #tpu.memory_space<vmem>>, vector<1x4xf32>
    %4 = vector.broadcast %3 : vector<1x4xf32> to vector<16x4xf32>
    %5 = arith.addf %2, %4 : vector<16x4xf32>
    %6 = arith.truncf %5 : vector<16x4xf32> to vector<16x4xbf16>
    %c0_5 = arith.constant 0 : index
    %c0_6 = arith.constant 0 : index
    %7 = vector.load %arg4[%c0_5, %c0_6] : memref<16x4xbf16, #tpu.memory_space<vmem>>, vector<16x4xbf16>
    tpu.vector_store %arg4[%c0_5, %c0_6], %6 {strides = array<i32>} : memref<16x4xbf16, #tpu.memory_space<vmem>>, vector<16x4xbf16>,
    return
  }
  func.func @transform_0(%arg0: i32) -> (i32, i32) {
    %c0_i32 = arith.constant 0 : i32
    %c0_i32_0 = arith.constant 0 : i32
    return %arg0, %c0_i32 : i32, i32
  }
  func.func @transform_1(%arg0: i32) -> (i32, i32) {
    %c0_i32 = arith.constant 0 : i32
    %c0_i32_0 = arith.constant 0 : i32
    %c0_i32_1 = arith.constant 0 : i32
    return %c0_i32, %c0_i32_0 : i32, i32
  }
  func.func @transform_2(%arg0: i32) -> (i32, i32) {
    %c0_i32 = arith.constant 0 : i32
    %c0_i32_0 = arith.constant 0 : i32
    %c0_i32_1 = arith.constant 0 : i32
    return %c0_i32, %c0_i32_0 : i32, i32
  }
  func.func @transform_3(%arg0: i32) -> (i32, i32) {
    %c0_i32 = arith.constant 0 : i32
    %c0_i32_0 = arith.constant 0 : i32
    return %arg0, %c0_i32 : i32, i32
  }
}

</mosaic_0001>

<bundles_post_ra>
// kernel: tpu_custom_call.1
= control target key start
LH: loop header
LB: loop body
LE: loop exit
PB: predicated region body
PF: predicated region fallthrough
CT: control target
= control target key end

     0   :  { %v117_v0 = vmov 0.0   ;;  %vm118_vm0 = vmmov 0   ;;  %vm37_vm1 = vcmask 130048   ;;  %vm90_vm2 = vcmask 27648   ;;  %s154_s1 = inlined_call_operand.vmem [shape: bf16[16,4], index: 1, kind: input, shape index: {}]   ;;  %s155_s0 = inlined_call_operand.vmem [shape: bf16[16,16], index: 0, kind: input, shape index: {}]   ;;  %s156_s2 = inlined_call_operand.vmem [shape: f32[1,4], index: 2, kind: input, shape index: {}]   ;;  %s157_s3 = inlined_call_operand.vmem [shape: bf16[16,4], index: 3, kind: output, shape index: {}]  }
   0x1   :  { %107 = vmatprep.subr.bf16.mxu0 %v117_v0  ;;  %v115_v1 = vld [vmem:[%s154_s1] sm:$0xff]   ;;  %109 = vmatprep.mubr.msk.bf16.mxu0 %vm118_vm0, %v117_v0 }
   0x2   :  { %v116_v2 = vld [vmem:[%s155_s0] sm:$0xff]   ;;  %108 = vmatpush3.bf16.msra.mxu0 %v115_v1 }
   0x3   :  { %v97_v3 = vld [vmem:[%s156_s2] ss:$0 sm:$0xff] }
   0x5   :  { %110 = vmatmul.mubr.msk.bf16.vlgmr.msra.gmra.mrb[0].mxu0 %vm37_vm1, %v116_v2 }
  0xd8   :  { %v75_v4 = vpop.f32.mrb[0].mxu0 }
  0xd9   :  { %v76_v5 = vadd.f32 %v97_v3, %v75_v4  ;;  %v111_v6 = vpop.f32.mrb[1].mxu0 }
  0xda   :  { %v78_v7 = vpop.f32.mrb[2].mxu0 }
  0xdb   :  { %v103_v8 = vpack.c.bf16 %v76_v5, %v76_v5  ;;  %v79_v9 = vadd.f32 %v97_v3, %v78_v7  ;;  %v112_v10 = vpop.f32.mrb[3].mxu0 }
  0xdd   :  { %91 = vst.msk [vmem:[%s157_s3] sm:$0xf] %vm90_vm2, %v103_v8  ;;  %v104_v11 = vpack.c.bf16 %v79_v9, %v79_v9 }
  0xdf   :  { %92 = vst.msk [vmem:[%s157_s3 + $0x4] sm:$0xf] %vm90_vm2, %v104_v11 }

</bundles_post_ra>
